<compile_context>
chip_gen: v7x
topology: tpu7x:2x2x1
jax: 0.10.0
libtpu: 0.0.40
codegen_flags: <defaults>
</compile_context>

<pallas_src>
import functools

import jax
import jax.numpy as jnp
from jax.experimental import pallas as pl
from jax.experimental.pallas import tpu as pltpu


def combiner_gather_kernel(ids_ref, *refs, segments):
    """Row-gather kernel.

    ids_ref   : SMEM (Sseg,) int32 -- token ids of all segments, concatenated.
    refs[:n]  : ANY/HBM (V_i, D)   -- per-transformer embedding tables (same D, dtype).
    refs[n]   : VMEM (Sseg, D) out -- fused tgt embeddings (tgt0 ; tgt1 ; ...).
    refs[n+1] : DMA semaphore (1,) -- shared by every row copy.
    """
    n = len(segments)
    tables = refs[:n]
    tgt_ref = refs[n]
    sem = refs[n + 1]

    # 1) Issue one row DMA per token: table[id] (HBM) -> its row of the fused VMEM
    #    slab. Fully unrolled (segments are static), all descriptors issued before
    #    any other work so every copy is in flight together, all signaling the same
    #    semaphore. No vector stores are interleaved with descriptor issue.
    row = 0
    for s_idx, seg_len in enumerate(segments):
        tab = tables[s_idx]
        for _ in range(seg_len):
            tok = ids_ref[row]  # ids assumed in-range; a DMA gather does not check.
            pltpu.make_async_copy(
                tab.at[pl.ds(tok, 1)],        # (1, D) row in HBM
                tgt_ref.at[pl.ds(row, 1)],    # (1, D) row of the VMEM output
                sem.at[0],
            ).start()
            row += 1

    # 2) Aggregated drain: DMA semaphores count bytes copied. Every row copy moved
    #    one (1, D) slab of the output dtype, so a single dummy descriptor covering
    #    the full (Sseg, D) slab waits for exactly the sum of all row copies.
    pltpu.make_async_copy(tgt_ref, tgt_ref, sem.at[0]).wait()


def combiner_embedding_forward(token_ids_list, segments, params, eps=1e-12):
    """Returns (embeddings, tgt_cat, segment_bias) with the PyTorch (1, S, D) layout.

    params["word"], params["pos"], params["gamma"], params["beta"] correspond to the
    module's word/position/LayerNorm parameters; that branch is dead in the reference
    forward (its result is overwritten), so it is intentionally not computed.
    """
    segments = tuple(int(s) for s in segments)
    n = len(segments)
    assert len(token_ids_list) == n
    seq_lens = tuple(int(t.shape[1]) for t in token_ids_list)
    assert seq_lens == segments
    Sseg = sum(segments)

    tables = [params[f"t{i}"] for i in range(n)]
    dt = tables[0].dtype
    D = int(tables[0].shape[1])
    # The aggregated byte-count drain requires identical row width/dtype across tables.
    assert all(t.dtype == dt and int(t.shape[1]) == D for t in tables)

    # Lane-dense rows: pad the embed dim to a multiple of 128 (BERT's 768 already is;
    # only taken for odd configs).
    D_pad = max(128, -(-D // 128) * 128)
    if D_pad != D:
        tables = [jnp.pad(t, ((0, 0), (0, D_pad - D))) for t in tables]

    # Token ids of all segments, concatenated, as a flat int32 vector (SMEM-resident
    # in the kernel: they are used only as scalar DMA row indices).
    ids = jnp.concatenate([t.reshape(-1).astype(jnp.int32) for t in token_ids_list])

    kernel = functools.partial(combiner_gather_kernel, segments=segments)

    itemsize = jnp.dtype(dt).itemsize
    out_bytes = Sseg * D_pad * itemsize
    # Size the VMEM request to the actual footprint (+slack), not a large fixed cap.
    vmem_limit_bytes = int(max(4 * 1024 * 1024, out_bytes + 2 * 1024 * 1024))

    fused = pl.pallas_call(
        kernel,
        out_shape=jax.ShapeDtypeStruct((Sseg, D_pad), dt),
        in_specs=(
            [pl.BlockSpec(memory_space=pltpu.MemorySpace.SMEM)]   # ids
            + [pl.BlockSpec(memory_space=pl.ANY)] * n             # big tables stay in HBM
        ),
        out_specs=pl.BlockSpec(memory_space=pltpu.MemorySpace.VMEM),
        scratch_shapes=[pltpu.SemaphoreType.DMA((1,))],            # one shared DMA sem
        compiler_params=pltpu.CompilerParams(vmem_limit_bytes=vmem_limit_bytes),
    )(ids, *tables)

    if D_pad != D:
        fused = fused[:, :D]

    tgt_cat = fused[None]                                      # (1, Sseg, D)
    embeddings = tgt_cat[:, Sseg - segments[-1]:, :]           # last transformer's rows

    # segment_bias: segment i gets id i+1 of the (tiny) segment table -- the segment
    # id structure is static, so this is trivial broadcast work done in the wrapper
    # (per the perf review), keeping the kernel to the real gather.
    seg_ids = jnp.concatenate(
        [jnp.full((s,), i + 1, dtype=jnp.int32) for i, s in enumerate(segments)])
    segment_bias = jnp.take(params["seg"], seg_ids, axis=0)[None]   # (1, Sseg, D)

    return embeddings, tgt_cat, segment_bias


if __name__ == "__main__":
    key = jax.random.PRNGKey(0)
    # num_vocabs, embed_dim, max_num_tokens, max_num_segments. D=128 keeps each
    # gathered row lane-dense (one full 128-lane row per DMA).
    V, D, P, NSEG = 64, 128, 16, 4
    S0, S1 = 8, 8
    segments = (S0, S1)

    ks = jax.random.split(key, 7)
    word = (0.02 * jax.random.normal(ks[0], (V, D), jnp.float32)).at[0].set(0.0)   # padding_idx=0
    pos = 0.02 * jax.random.normal(ks[1], (P, D), jnp.float32)
    seg = (0.02 * jax.random.normal(ks[2], (NSEG, D), jnp.float32)).at[0].set(0.0)  # padding_idx=0
    gamma = jnp.ones((1, D), jnp.float32)
    beta = jnp.zeros((1, D), jnp.float32)
    # Per-transformer lookup tables; row 0 zeroed to honor the padding contract.
    t0 = (0.02 * jax.random.normal(ks[3], (V, D), jnp.float32)).at[0].set(0.0)
    t1 = (0.02 * jax.random.normal(ks[4], (V, D), jnp.float32)).at[0].set(0.0)

    token0 = jax.random.randint(ks[5], (1, S0), 0, V, jnp.int32)
    token1 = jax.random.randint(ks[6], (1, S1), 0, V, jnp.int32)

    params = dict(word=word, pos=pos, seg=seg, gamma=gamma, beta=beta, t0=t0, t1=t1)

    emb, tgt_cat, seg_bias = combiner_embedding_forward([token0, token1], segments, params)
    jax.block_until_ready((emb, tgt_cat, seg_bias))

    # Pure-JAX reference check of the returned values.
    seg_ids_ref = jnp.concatenate(
        [jnp.full((s,), i + 1, dtype=jnp.int32) for i, s in enumerate(segments)])[None]
    emb_ref = jnp.take(t1, token1[0], axis=0)[None]
    tgt_cat_ref = jnp.concatenate(
        [jnp.take(t0, token0[0], axis=0)[None], jnp.take(t1, token1[0], axis=0)[None]], axis=1)
    seg_bias_ref = jnp.take(seg, seg_ids_ref[0], axis=0)[None]

    assert emb.shape == (1, S1, D)
    assert tgt_cat.shape == (1, S0 + S1, D)
    assert seg_bias.shape == (1, S0 + S1, D)
    assert jnp.allclose(emb, emb_ref, atol=1e-6)
    assert jnp.allclose(tgt_cat, tgt_cat_ref, atol=1e-6)
    assert jnp.allclose(seg_bias, seg_bias_ref, atol=1e-6)

    print("KERNEL_OK")
</pallas_src>

<mosaic_0001>
module attributes {stable_mosaic.version = 11 : i64} {
  func.func @combiner_gather_kernel(%arg0: memref<16xi32, #tpu.memory_space<smem>>, %arg1: memref<64x128xf32, #tpu.memory_space<any>>, %arg2: memref<64x128xf32, #tpu.memory_space<any>>, %arg3: memref<16x128xf32, #tpu.memory_space<vmem>>, %arg4: memref<1x!tpu.dma_semaphore, #tpu.memory_space<semaphore_mem>>) attributes {dimension_semantics = [], scalar_prefetch = 0 : i64, scratch_operands = 1 : i64, tpu.core_type = #tpu.core_type<tc>} {
    %c0 = arith.constant 0 : index
    %0 = memref.load %arg0[%c0] : memref<16xi32, #tpu.memory_space<smem>>
    %c0_i32 = arith.constant 0 : i32
    %c0_i32_0 = arith.constant 0 : i32
    %1 = tpu.memref_slice %arg1[%0, %c0_i32_0] : memref<64x128xf32, #tpu.memory_space<any>> -> memref<1x128xf32, #tpu.memory_space<any>>
    %c0_i32_1 = arith.constant 0 : i32
    %c0_i32_2 = arith.constant 0 : i32
    %2 = tpu.memref_slice %arg3[%c0_i32_1, %c0_i32_2] : memref<16x128xf32, #tpu.memory_space<vmem>> -> memref<1x128xf32, #tpu.memory_space<vmem>>
    %3 = tpu.memref_slice %arg4[%c0_i32] : memref<1x!tpu.dma_semaphore, #tpu.memory_space<semaphore_mem>> -> memref<1x!tpu.dma_semaphore, #tpu.memory_space<semaphore_mem>>
    %4 = tpu.memref_squeeze %3 : memref<1x!tpu.dma_semaphore, #tpu.memory_space<semaphore_mem>> -> memref<!tpu.dma_semaphore, #tpu.memory_space<semaphore_mem>>
    tpu.enqueue_dma source(%1 : memref<1x128xf32, #tpu.memory_space<any>>) target(%2 : memref<1x128xf32, #tpu.memory_space<vmem>>) target_semaphore(%4 : memref<!tpu.dma_semaphore, #tpu.memory_space<semaphore_mem>>)
    %c1 = arith.constant 1 : index
    %5 = memref.load %arg0[%c1] : memref<16xi32, #tpu.memory_space<smem>>
    %c0_i32_3 = arith.constant 0 : i32
    %c0_i32_4 = arith.constant 0 : i32
    %6 = tpu.memref_slice %arg1[%5, %c0_i32_4] : memref<64x128xf32, #tpu.memory_space<any>> -> memref<1x128xf32, #tpu.memory_space<any>>
    %c1_i32 = arith.constant 1 : i32
    %c0_i32_5 = arith.constant 0 : i32
    %7 = tpu.memref_slice %arg3[%c1_i32, %c0_i32_5] : memref<16x128xf32, #tpu.memory_space<vmem>> -> memref<1x128xf32, #tpu.memory_space<vmem>>
    %8 = tpu.memref_slice %arg4[%c0_i32_3] : memref<1x!tpu.dma_semaphore, #tpu.memory_space<semaphore_mem>> -> memref<1x!tpu.dma_semaphore, #tpu.memory_space<semaphore_mem>>
    %9 = tpu.memref_squeeze %8 : memref<1x!tpu.dma_semaphore, #tpu.memory_space<semaphore_mem>> -> memref<!tpu.dma_semaphore, #tpu.memory_space<semaphore_mem>>
    tpu.enqueue_dma source(%6 : memref<1x128xf32, #tpu.memory_space<any>>) target(%7 : memref<1x128xf32, #tpu.memory_space<vmem>>) target_semaphore(%9 : memref<!tpu.dma_semaphore, #tpu.memory_space<semaphore_mem>>)
    %c2 = arith.constant 2 : index
    %10 = memref.load %arg0[%c2] : memref<16xi32, #tpu.memory_space<smem>>
    %c0_i32_6 = arith.constant 0 : i32
    %c0_i32_7 = arith.constant 0 : i32
    %11 = tpu.memref_slice %arg1[%10, %c0_i32_7] : memref<64x128xf32, #tpu.memory_space<any>> -> memref<1x128xf32, #tpu.memory_space<any>>
    %c2_i32 = arith.constant 2 : i32
    %c0_i32_8 = arith.constant 0 : i32
    %12 = tpu.memref_slice %arg3[%c2_i32, %c0_i32_8] : memref<16x128xf32, #tpu.memory_space<vmem>> -> memref<1x128xf32, #tpu.memory_space<vmem>>
    %13 = tpu.memref_slice %arg4[%c0_i32_6] : memref<1x!tpu.dma_semaphore, #tpu.memory_space<semaphore_mem>> -> memref<1x!tpu.dma_semaphore, #tpu.memory_space<semaphore_mem>>
    %14 = tpu.memref_squeeze %13 : memref<1x!tpu.dma_semaphore, #tpu.memory_space<semaphore_mem>> -> memref<!tpu.dma_semaphore, #tpu.memory_space<semaphore_mem>>
    tpu.enqueue_dma source(%11 : memref<1x128xf32, #tpu.memory_space<any>>) target(%12 : memref<1x128xf32, #tpu.memory_space<vmem>>) target_semaphore(%14 : memref<!tpu.dma_semaphore, #tpu.memory_space<semaphore_mem>>)
    %c3 = arith.constant 3 : index
    %15 = memref.load %arg0[%c3] : memref<16xi32, #tpu.memory_space<smem>>
    %c0_i32_9 = arith.constant 0 : i32
    %c0_i32_10 = arith.constant 0 : i32
    %16 = tpu.memref_slice %arg1[%15, %c0_i32_10] : memref<64x128xf32, #tpu.memory_space<any>> -> memref<1x128xf32, #tpu.memory_space<any>>
    %c3_i32 = arith.constant 3 : i32
    %c0_i32_11 = arith.constant 0 : i32
    %17 = tpu.memref_slice %arg3[%c3_i32, %c0_i32_11] : memref<16x128xf32, #tpu.memory_space<vmem>> -> memref<1x128xf32, #tpu.memory_space<vmem>>
    %18 = tpu.memref_slice %arg4[%c0_i32_9] : memref<1x!tpu.dma_semaphore, #tpu.memory_space<semaphore_mem>> -> memref<1x!tpu.dma_semaphore, #tpu.memory_space<semaphore_mem>>
    %19 = tpu.memref_squeeze %18 : memref<1x!tpu.dma_semaphore, #tpu.memory_space<semaphore_mem>> -> memref<!tpu.dma_semaphore, #tpu.memory_space<semaphore_mem>>
    tpu.enqueue_dma source(%16 : memref<1x128xf32, #tpu.memory_space<any>>) target(%17 : memref<1x128xf32, #tpu.memory_space<vmem>>) target_semaphore(%19 : memref<!tpu.dma_semaphore, #tpu.memory_space<semaphore_mem>>)
    %c4 = arith.constant 4 : index
    %20 = memref.load %arg0[%c4] : memref<16xi32, #tpu.memory_space<smem>>
    %c0_i32_12 = arith.constant 0 : i32
    %c0_i32_13 = arith.constant 0 : i32
    %21 = tpu.memref_slice %arg1[%20, %c0_i32_13] : memref<64x128xf32, #tpu.memory_space<any>> -> memref<1x128xf32, #tpu.memory_space<any>>
    %c4_i32 = arith.constant 4 : i32
    %c0_i32_14 = arith.constant 0 : i32
    %22 = tpu.memref_slice %arg3[%c4_i32, %c0_i32_14] : memref<16x128xf32, #tpu.memory_space<vmem>> -> memref<1x128xf32, #tpu.memory_space<vmem>>
    %23 = tpu.memref_slice %arg4[%c0_i32_12] : memref<1x!tpu.dma_semaphore, #tpu.memory_space<semaphore_mem>> -> memref<1x!tpu.dma_semaphore, #tpu.memory_space<semaphore_mem>>
    %24 = tpu.memref_squeeze %23 : memref<1x!tpu.dma_semaphore, #tpu.memory_space<semaphore_mem>> -> memref<!tpu.dma_semaphore, #tpu.memory_space<semaphore_mem>>
    tpu.enqueue_dma source(%21 : memref<1x128xf32, #tpu.memory_space<any>>) target(%22 : memref<1x128xf32, #tpu.memory_space<vmem>>) target_semaphore(%24 : memref<!tpu.dma_semaphore, #tpu.memory_space<semaphore_mem>>)
    %c5 = arith.constant 5 : index
    %25 = memref.load %arg0[%c5] : memref<16xi32, #tpu.memory_space<smem>>
    %c0_i32_15 = arith.constant 0 : i32
    %c0_i32_16 = arith.constant 0 : i32
    %26 = tpu.memref_slice %arg1[%25, %c0_i32_16] : memref<64x128xf32, #tpu.memory_space<any>> -> memref<1x128xf32, #tpu.memory_space<any>>
    %c5_i32 = arith.constant 5 : i32
    %c0_i32_17 = arith.constant 0 : i32
    %27 = tpu.memref_slice %arg3[%c5_i32, %c0_i32_17] : memref<16x128xf32, #tpu.memory_space<vmem>> -> memref<1x128xf32, #tpu.memory_space<vmem>>
    %28 = tpu.memref_slice %arg4[%c0_i32_15] : memref<1x!tpu.dma_semaphore, #tpu.memory_space<semaphore_mem>> -> memref<1x!tpu.dma_semaphore, #tpu.memory_space<semaphore_mem>>
    %29 = tpu.memref_squeeze %28 : memref<1x!tpu.dma_semaphore, #tpu.memory_space<semaphore_mem>> -> memref<!tpu.dma_semaphore, #tpu.memory_space<semaphore_mem>>
    tpu.enqueue_dma source(%26 : memref<1x128xf32, #tpu.memory_space<any>>) target(%27 : memref<1x128xf32, #tpu.memory_space<vmem>>) target_semaphore(%29 : memref<!tpu.dma_semaphore, #tpu.memory_space<semaphore_mem>>)
    %c6 = arith.constant 6 : index
    %30 = memref.load %arg0[%c6] : memref<16xi32, #tpu.memory_space<smem>>
    %c0_i32_18 = arith.constant 0 : i32
    %c0_i32_19 = arith.constant 0 : i32
    %31 = tpu.memref_slice %arg1[%30, %c0_i32_19] : memref<64x128xf32, #tpu.memory_space<any>> -> memref<1x128xf32, #tpu.memory_space<any>>
    %c6_i32 = arith.constant 6 : i32
    %c0_i32_20 = arith.constant 0 : i32
    %32 = tpu.memref_slice %arg3[%c6_i32, %c0_i32_20] : memref<16x128xf32, #tpu.memory_space<vmem>> -> memref<1x128xf32, #tpu.memory_space<vmem>>
    %33 = tpu.memref_slice %arg4[%c0_i32_18] : memref<1x!tpu.dma_semaphore, #tpu.memory_space<semaphore_mem>> -> memref<1x!tpu.dma_semaphore, #tpu.memory_space<semaphore_mem>>
    %34 = tpu.memref_squeeze %33 : memref<1x!tpu.dma_semaphore, #tpu.memory_space<semaphore_mem>> -> memref<!tpu.dma_semaphore, #tpu.memory_space<semaphore_mem>>
    tpu.enqueue_dma source(%31 : memref<1x128xf32, #tpu.memory_space<any>>) target(%32 : memref<1x128xf32, #tpu.memory_space<vmem>>) target_semaphore(%34 : memref<!tpu.dma_semaphore, #tpu.memory_space<semaphore_mem>>)
    %c7 = arith.constant 7 : index
    %35 = memref.load %arg0[%c7] : memref<16xi32, #tpu.memory_space<smem>>
    %c0_i32_21 = arith.constant 0 : i32
    %c0_i32_22 = arith.constant 0 : i32
    %36 = tpu.memref_slice %arg1[%35, %c0_i32_22] : memref<64x128xf32, #tpu.memory_space<any>> -> memref<1x128xf32, #tpu.memory_space<any>>
    %c7_i32 = arith.constant 7 : i32
    %c0_i32_23 = arith.constant 0 : i32
    %37 = tpu.memref_slice %arg3[%c7_i32, %c0_i32_23] : memref<16x128xf32, #tpu.memory_space<vmem>> -> memref<1x128xf32, #tpu.memory_space<vmem>>
    %38 = tpu.memref_slice %arg4[%c0_i32_21] : memref<1x!tpu.dma_semaphore, #tpu.memory_space<semaphore_mem>> -> memref<1x!tpu.dma_semaphore, #tpu.memory_space<semaphore_mem>>
    %39 = tpu.memref_squeeze %38 : memref<1x!tpu.dma_semaphore, #tpu.memory_space<semaphore_mem>> -> memref<!tpu.dma_semaphore, #tpu.memory_space<semaphore_mem>>
    tpu.enqueue_dma source(%36 : memref<1x128xf32, #tpu.memory_space<any>>) target(%37 : memref<1x128xf32, #tpu.memory_space<vmem>>) target_semaphore(%39 : memref<!tpu.dma_semaphore, #tpu.memory_space<semaphore_mem>>)
    %c8 = arith.constant 8 : index
    %40 = memref.load %arg0[%c8] : memref<16xi32, #tpu.memory_space<smem>>
    %c0_i32_24 = arith.constant 0 : i32
    %c0_i32_25 = arith.constant 0 : i32
    %41 = tpu.memref_slice %arg2[%40, %c0_i32_25] : memref<64x128xf32, #tpu.memory_space<any>> -> memref<1x128xf32, #tpu.memory_space<any>>
    %c8_i32 = arith.constant 8 : i32
    %c0_i32_26 = arith.constant 0 : i32
    %42 = tpu.memref_slice %arg3[%c8_i32, %c0_i32_26] : memref<16x128xf32, #tpu.memory_space<vmem>> -> memref<1x128xf32, #tpu.memory_space<vmem>>
    %43 = tpu.memref_slice %arg4[%c0_i32_24] : memref<1x!tpu.dma_semaphore, #tpu.memory_space<semaphore_mem>> -> memref<1x!tpu.dma_semaphore, #tpu.memory_space<semaphore_mem>>
    %44 = tpu.memref_squeeze %43 : memref<1x!tpu.dma_semaphore, #tpu.memory_space<semaphore_mem>> -> memref<!tpu.dma_semaphore, #tpu.memory_space<semaphore_mem>>
    tpu.enqueue_dma source(%41 : memref<1x128xf32, #tpu.memory_space<any>>) target(%42 : memref<1x128xf32, #tpu.memory_space<vmem>>) target_semaphore(%44 : memref<!tpu.dma_semaphore, #tpu.memory_space<semaphore_mem>>)
    %c9 = arith.constant 9 : index
    %45 = memref.load %arg0[%c9] : memref<16xi32, #tpu.memory_space<smem>>
    %c0_i32_27 = arith.constant 0 : i32
    %c0_i32_28 = arith.constant 0 : i32
    %46 = tpu.memref_slice %arg2[%45, %c0_i32_28] : memref<64x128xf32, #tpu.memory_space<any>> -> memref<1x128xf32, #tpu.memory_space<any>>
    %c9_i32 = arith.constant 9 : i32
    %c0_i32_29 = arith.constant 0 : i32
    %47 = tpu.memref_slice %arg3[%c9_i32, %c0_i32_29] : memref<16x128xf32, #tpu.memory_space<vmem>> -> memref<1x128xf32, #tpu.memory_space<vmem>>
    %48 = tpu.memref_slice %arg4[%c0_i32_27] : memref<1x!tpu.dma_semaphore, #tpu.memory_space<semaphore_mem>> -> memref<1x!tpu.dma_semaphore, #tpu.memory_space<semaphore_mem>>
    %49 = tpu.memref_squeeze %48 : memref<1x!tpu.dma_semaphore, #tpu.memory_space<semaphore_mem>> -> memref<!tpu.dma_semaphore, #tpu.memory_space<semaphore_mem>>
    tpu.enqueue_dma source(%46 : memref<1x128xf32, #tpu.memory_space<any>>) target(%47 : memref<1x128xf32, #tpu.memory_space<vmem>>) target_semaphore(%49 : memref<!tpu.dma_semaphore, #tpu.memory_space<semaphore_mem>>)
    %c10 = arith.constant 10 : index
    %50 = memref.load %arg0[%c10] : memref<16xi32, #tpu.memory_space<smem>>
    %c0_i32_30 = arith.constant 0 : i32
    %c0_i32_31 = arith.constant 0 : i32
    %51 = tpu.memref_slice %arg2[%50, %c0_i32_31] : memref<64x128xf32, #tpu.memory_space<any>> -> memref<1x128xf32, #tpu.memory_space<any>>
    %c10_i32 = arith.constant 10 : i32
    %c0_i32_32 = arith.constant 0 : i32
    %52 = tpu.memref_slice %arg3[%c10_i32, %c0_i32_32] : memref<16x128xf32, #tpu.memory_space<vmem>> -> memref<1x128xf32, #tpu.memory_space<vmem>>
    %53 = tpu.memref_slice %arg4[%c0_i32_30] : memref<1x!tpu.dma_semaphore, #tpu.memory_space<semaphore_mem>> -> memref<1x!tpu.dma_semaphore, #tpu.memory_space<semaphore_mem>>
    %54 = tpu.memref_squeeze %53 : memref<1x!tpu.dma_semaphore, #tpu.memory_space<semaphore_mem>> -> memref<!tpu.dma_semaphore, #tpu.memory_space<semaphore_mem>>
    tpu.enqueue_dma source(%51 : memref<1x128xf32, #tpu.memory_space<any>>) target(%52 : memref<1x128xf32, #tpu.memory_space<vmem>>) target_semaphore(%54 : memref<!tpu.dma_semaphore, #tpu.memory_space<semaphore_mem>>)
    %c11 = arith.constant 11 : index
    %55 = memref.load %arg0[%c11] : memref<16xi32, #tpu.memory_space<smem>>
    %c0_i32_33 = arith.constant 0 : i32
    %c0_i32_34 = arith.constant 0 : i32
    %56 = tpu.memref_slice %arg2[%55, %c0_i32_34] : memref<64x128xf32, #tpu.memory_space<any>> -> memref<1x128xf32, #tpu.memory_space<any>>
    %c11_i32 = arith.constant 11 : i32
    %c0_i32_35 = arith.constant 0 : i32
    %57 = tpu.memref_slice %arg3[%c11_i32, %c0_i32_35] : memref<16x128xf32, #tpu.memory_space<vmem>> -> memref<1x128xf32, #tpu.memory_space<vmem>>
    %58 = tpu.memref_slice %arg4[%c0_i32_33] : memref<1x!tpu.dma_semaphore, #tpu.memory_space<semaphore_mem>> -> memref<1x!tpu.dma_semaphore, #tpu.memory_space<semaphore_mem>>
    %59 = tpu.memref_squeeze %58 : memref<1x!tpu.dma_semaphore, #tpu.memory_space<semaphore_mem>> -> memref<!tpu.dma_semaphore, #tpu.memory_space<semaphore_mem>>
    tpu.enqueue_dma source(%56 : memref<1x128xf32, #tpu.memory_space<any>>) target(%57 : memref<1x128xf32, #tpu.memory_space<vmem>>) target_semaphore(%59 : memref<!tpu.dma_semaphore, #tpu.memory_space<semaphore_mem>>)
    %c12 = arith.constant 12 : index
    %60 = memref.load %arg0[%c12] : memref<16xi32, #tpu.memory_space<smem>>
    %c0_i32_36 = arith.constant 0 : i32
    %c0_i32_37 = arith.constant 0 : i32
    %61 = tpu.memref_slice %arg2[%60, %c0_i32_37] : memref<64x128xf32, #tpu.memory_space<any>> -> memref<1x128xf32, #tpu.memory_space<any>>
    %c12_i32 = arith.constant 12 : i32
    %c0_i32_38 = arith.constant 0 : i32
    %62 = tpu.memref_slice %arg3[%c12_i32, %c0_i32_38] : memref<16x128xf32, #tpu.memory_space<vmem>> -> memref<1x128xf32, #tpu.memory_space<vmem>>
    %63 = tpu.memref_slice %arg4[%c0_i32_36] : memref<1x!tpu.dma_semaphore, #tpu.memory_space<semaphore_mem>> -> memref<1x!tpu.dma_semaphore, #tpu.memory_space<semaphore_mem>>
    %64 = tpu.memref_squeeze %63 : memref<1x!tpu.dma_semaphore, #tpu.memory_space<semaphore_mem>> -> memref<!tpu.dma_semaphore, #tpu.memory_space<semaphore_mem>>
    tpu.enqueue_dma source(%61 : memref<1x128xf32, #tpu.memory_space<any>>) target(%62 : memref<1x128xf32, #tpu.memory_space<vmem>>) target_semaphore(%64 : memref<!tpu.dma_semaphore, #tpu.memory_space<semaphore_mem>>)
    %c13 = arith.constant 13 : index
    %65 = memref.load %arg0[%c13] : memref<16xi32, #tpu.memory_space<smem>>
    %c0_i32_39 = arith.constant 0 : i32
    %c0_i32_40 = arith.constant 0 : i32
    %66 = tpu.memref_slice %arg2[%65, %c0_i32_40] : memref<64x128xf32, #tpu.memory_space<any>> -> memref<1x128xf32, #tpu.memory_space<any>>
    %c13_i32 = arith.constant 13 : i32
    %c0_i32_41 = arith.constant 0 : i32
    %67 = tpu.memref_slice %arg3[%c13_i32, %c0_i32_41] : memref<16x128xf32, #tpu.memory_space<vmem>> -> memref<1x128xf32, #tpu.memory_space<vmem>>
    %68 = tpu.memref_slice %arg4[%c0_i32_39] : memref<1x!tpu.dma_semaphore, #tpu.memory_space<semaphore_mem>> -> memref<1x!tpu.dma_semaphore, #tpu.memory_space<semaphore_mem>>
    %69 = tpu.memref_squeeze %68 : memref<1x!tpu.dma_semaphore, #tpu.memory_space<semaphore_mem>> -> memref<!tpu.dma_semaphore, #tpu.memory_space<semaphore_mem>>
    tpu.enqueue_dma source(%66 : memref<1x128xf32, #tpu.memory_space<any>>) target(%67 : memref<1x128xf32, #tpu.memory_space<vmem>>) target_semaphore(%69 : memref<!tpu.dma_semaphore, #tpu.memory_space<semaphore_mem>>)
    %c14 = arith.constant 14 : index
    %70 = memref.load %arg0[%c14] : memref<16xi32, #tpu.memory_space<smem>>
    %c0_i32_42 = arith.constant 0 : i32
    %c0_i32_43 = arith.constant 0 : i32
    %71 = tpu.memref_slice %arg2[%70, %c0_i32_43] : memref<64x128xf32, #tpu.memory_space<any>> -> memref<1x128xf32, #tpu.memory_space<any>>
    %c14_i32 = arith.constant 14 : i32
    %c0_i32_44 = arith.constant 0 : i32
    %72 = tpu.memref_slice %arg3[%c14_i32, %c0_i32_44] : memref<16x128xf32, #tpu.memory_space<vmem>> -> memref<1x128xf32, #tpu.memory_space<vmem>>
    %73 = tpu.memref_slice %arg4[%c0_i32_42] : memref<1x!tpu.dma_semaphore, #tpu.memory_space<semaphore_mem>> -> memref<1x!tpu.dma_semaphore, #tpu.memory_space<semaphore_mem>>
    %74 = tpu.memref_squeeze %73 : memref<1x!tpu.dma_semaphore, #tpu.memory_space<semaphore_mem>> -> memref<!tpu.dma_semaphore, #tpu.memory_space<semaphore_mem>>
    tpu.enqueue_dma source(%71 : memref<1x128xf32, #tpu.memory_space<any>>) target(%72 : memref<1x128xf32, #tpu.memory_space<vmem>>) target_semaphore(%74 : memref<!tpu.dma_semaphore, #tpu.memory_space<semaphore_mem>>)
    %c15 = arith.constant 15 : index
    %75 = memref.load %arg0[%c15] : memref<16xi32, #tpu.memory_space<smem>>
    %c0_i32_45 = arith.constant 0 : i32
    %c0_i32_46 = arith.constant 0 : i32
    %76 = tpu.memref_slice %arg2[%75, %c0_i32_46] : memref<64x128xf32, #tpu.memory_space<any>> -> memref<1x128xf32, #tpu.memory_space<any>>
    %c15_i32 = arith.constant 15 : i32
    %c0_i32_47 = arith.constant 0 : i32
    %77 = tpu.memref_slice %arg3[%c15_i32, %c0_i32_47] : memref<16x128xf32, #tpu.memory_space<vmem>> -> memref<1x128xf32, #tpu.memory_space<vmem>>
    %78 = tpu.memref_slice %arg4[%c0_i32_45] : memref<1x!tpu.dma_semaphore, #tpu.memory_space<semaphore_mem>> -> memref<1x!tpu.dma_semaphore, #tpu.memory_space<semaphore_mem>>
    %79 = tpu.memref_squeeze %78 : memref<1x!tpu.dma_semaphore, #tpu.memory_space<semaphore_mem>> -> memref<!tpu.dma_semaphore, #tpu.memory_space<semaphore_mem>>
    tpu.enqueue_dma source(%76 : memref<1x128xf32, #tpu.memory_space<any>>) target(%77 : memref<1x128xf32, #tpu.memory_space<vmem>>) target_semaphore(%79 : memref<!tpu.dma_semaphore, #tpu.memory_space<semaphore_mem>>)
    %c0_i32_48 = arith.constant 0 : i32
    %80 = tpu.memref_slice %arg4[%c0_i32_48] : memref<1x!tpu.dma_semaphore, #tpu.memory_space<semaphore_mem>> -> memref<1x!tpu.dma_semaphore, #tpu.memory_space<semaphore_mem>>
    %81 = tpu.memref_squeeze %80 : memref<1x!tpu.dma_semaphore, #tpu.memory_space<semaphore_mem>> -> memref<!tpu.dma_semaphore, #tpu.memory_space<semaphore_mem>>
    tpu.wait_dma2 semaphore(%81 : memref<!tpu.dma_semaphore, #tpu.memory_space<semaphore_mem>>) src(%arg3 : memref<16x128xf32, #tpu.memory_space<vmem>>) dst(%arg3 : memref<16x128xf32, #tpu.memory_space<vmem>>)
    return
  }
}

</mosaic_0001>

<bundles_post_ra>
// kernel: tpu_custom_call.1
= control target key start
LH: loop header
LB: loop body
LE: loop exit
PB: predicated region body
PF: predicated region fallthrough
CT: control target
= control target key end

     0   :  { %8 = vsyncpa [#allocation5], 0  ;;  %s1134_s0 = inlined_call_operand.hbm [shape: s32[16], index: 0, kind: input, shape index: {}]   ;;  %s1135_s1 = inlined_call_operand.hbm [shape: f32[64,128], index: 1, kind: input, shape index: {}]   ;;  %s1136_s2 = inlined_call_operand.hbm [shape: f32[64,128], index: 2, kind: input, shape index: {}]   ;;  %s1137_s3 = inlined_call_operand.hbm [shape: f32[16,128], index: 3, kind: output, shape index: {}]  }
   0x1   :  { %9 = vsyncpa [#allocation4], 0  ;;  %s370_s14 = scalar_lea.hbm %s1134_s0, 16 }
   0x2   :  { %p371_p0 = scmp.ne.s32.totalorder %s1134_s0, %s370_s14  ;;  %p374_p1 = scmp.lt.u32.totalorder %s370_s14, %s1134_s0 }
   0x4   :  { %p376_p2 = pnand %p374_p1, %p371_p0 }
   0x6   :  { %379 = shalt.err (!%p376_p2)
}
   0x7   :  { %s792_s19 = smov [#allocation3]  }
   0x8   :  { %17 = dma.hbm_to_smem %s1134_s0, 16, %s792_s19, [#allocation5]  }
   0x9   :  { %786 = dma.done.wait [#allocation5], 16  }
   0xa   :  { %787 = vsyncadd [#allocation5], 4294967280 }
   0xb   :  { %21 = sfence }
   0xc   :  { %s22_s22 = sld [smem:[#allocation3]]  ;;  %s793_s23 = smov [#allocation6]  }
   0xd   :  { %s32_s24 = sshll.u32 %s793_s23, 4  ;;  %s843_s25 = sld [smem:[#allocation3 + $0x1]]  ;;  %s845_s24 = int_to_ptr.vmem [resolvable:$true] %s32_s24 }
   0xe   :  { %s794_s26 = smov [#allocation6 + $0x1]   ;;  %s847_s28 = sld [smem:[#allocation3 + $0x2]] }
   0xf   :  { %s47_s27 = sshll.u32 %s794_s26, 4  ;;  %s795_s29 = smov [#allocation6 + $0x2]   ;;  %s849_s27 = int_to_ptr.vmem [resolvable:$true] %s47_s27 }
  0x10   :  { %s62_s30 = sshll.u32 %s795_s29, 4  ;;  %s851_s0 = sld [smem:[#allocation3 + $0x3]]  ;;  %s853_s30 = int_to_ptr.vmem [resolvable:$true] %s62_s30 }
  0x11   :  { %s862_s12 = scalar_lea.hbm %s1135_s1, 1024 }
  0x12   :  { %s319_s4 = sshll.u32 %s22_s22, 4 }
  0x13   :  { %s24_s7 = scalar_lea.hbm %s1135_s1, %s319_s4  ;;  %s321_s8 = sshll.u32 %s843_s25, 4 }
  0x14   :  { %s380_s9 = scalar_lea.hbm %s24_s7, 16  ;;  %p383_p4 = scmp.lt.u32.totalorder %s24_s7, %s1135_s1 }
  0x15   :  { %p381_p3 = scmp.ne.s32.totalorder %s24_s7, %s380_s9  ;;  %p384_p5 = scmp.lt.u32.totalorder %s862_s12, %s380_s9 }
  0x16   :  { %p386_p7 = scmp.lt.u32.totalorder %s380_s9, %s24_s7 }
  0x17   :  { %p385_p6 = por %p384_p5, %p383_p4 }
  0x19   :  { %p387_p8 = por %p386_p7, %p385_p6 }
  0x1b   :  { %p388_p9 = pnand %p387_p8, %p381_p3 }
  0x1d   :  { %391 = shalt.err (!%p388_p9)  }
  0x1e   :  { %s392_s15 = scalar_lea.vmem %s845_s24, 16  ;;  %s871_s16 = scalar_lea.vmem %s845_s24, 256 }
  0x1f   :  { %p393_p10 = scmp.ne.s32.totalorder %s845_s24, %s392_s15  ;;  %p397_p11 = scmp.lt.s32.totalorder %s845_s24, %s845_s24 }
  0x20   :  { %p398_p12 = scmp.lt.s32.totalorder %s871_s16, %s392_s15 }
  0x22   :  { %p399_p13 = por %p398_p12, %p397_p11 }
  0x24   :  { %p400_p0 = pnand %p399_p13, %p393_p10 }
  0x26   :  { %403 = shalt.err (!%p400_p0)  }
  0x27   :  { %35 = dma.hbm_to_vmem [thread:$0]  %s24_s7, 16, %s845_s24, [#allocation2] }
  0x28   :  { %s38_s19 = scalar_lea.hbm %s1135_s1, %s321_s8  ;;  %s323_s20 = sshll.u32 %s847_s28, 4 }
  0x29   :  { %s404_s21 = scalar_lea.hbm %s38_s19, 16  ;;  %p407_p2 = scmp.lt.u32.totalorder %s38_s19, %s1135_s1 }
  0x2a   :  { %p405_p1 = scmp.ne.s32.totalorder %s38_s19, %s404_s21  ;;  %p408_p3 = scmp.lt.u32.totalorder %s862_s12, %s404_s21 }
  0x2b   :  { %p410_p5 = scmp.lt.u32.totalorder %s404_s21, %s38_s19 }
  0x2c   :  { %p409_p4 = por %p408_p3, %p407_p2 }
  0x2e   :  { %p411_p6 = por %p410_p5, %p409_p4 }
  0x30   :  { %p412_p7 = pnand %p411_p6, %p405_p1 }
  0x32   :  { %415 = shalt.err (!%p412_p7)  }
  0x33   :  { %s416_s25 = scalar_lea.vmem %s849_s27, 16  ;;  %p421_p9 = scmp.lt.s32.totalorder %s849_s27, %s845_s24 }
  0x34   :  { %p417_p8 = scmp.ne.s32.totalorder %s849_s27, %s416_s25  ;;  %p422_p10 = scmp.lt.s32.totalorder %s871_s16, %s416_s25 }
  0x36   :  { %p423_p12 = por %p422_p10, %p421_p9 }
  0x38   :  { %p424_p13 = pnand %p423_p12, %p417_p8 }
  0x3a   :  { %427 = shalt.err (!%p424_p13)  }
  0x3b   :  { %50 = dma.hbm_to_vmem [thread:$0]  %s38_s19, 16, %s849_s27, [#allocation2] }
  0x3c   :  { %s53_s29 = scalar_lea.hbm %s1135_s1, %s323_s20  ;;  %s325_s4 = sshll.u32 %s851_s0, 4 }
  0x3d   :  { %s428_s5 = scalar_lea.hbm %s53_s29, 16  ;;  %p431_p1 = scmp.lt.u32.totalorder %s53_s29, %s1135_s1 }
  0x3e   :  { %p429_p0 = scmp.ne.s32.totalorder %s53_s29, %s428_s5  ;;  %p432_p2 = scmp.lt.u32.totalorder %s862_s12, %s428_s5 }
  0x3f   :  { %p434_p4 = scmp.lt.u32.totalorder %s428_s5, %s53_s29 }
  0x40   :  { %p433_p3 = por %p432_p2, %p431_p1 }
  0x42   :  { %p435_p5 = por %p434_p4, %p433_p3 }
  0x44   :  { %p436_p6 = pnand %p435_p5, %p429_p0 }
  0x46   :  { %439 = shalt.err (!%p436_p6)  }
  0x47   :  { %s440_s27 = scalar_lea.vmem %s853_s30, 16  ;;  %p445_p8 = scmp.lt.s32.totalorder %s853_s30, %s845_s24 }
  0x48   :  { %p441_p7 = scmp.ne.s32.totalorder %s853_s30, %s440_s27  ;;  %p446_p9 = scmp.lt.s32.totalorder %s871_s16, %s440_s27 }
  0x4a   :  { %p447_p10 = por %p446_p9, %p445_p8 }
  0x4c   :  { %p448_p12 = pnand %p447_p10, %p441_p7 }
  0x4e   :  { %451 = shalt.err (!%p448_p12)  }
  0x4f   :  { %65 = dma.hbm_to_vmem [thread:$0]  %s53_s29, 16, %s853_s30, [#allocation2] }
  0x50   :  { %s68_s9 = scalar_lea.hbm %s1135_s1, %s325_s4  ;;  %s796_s10 = smov [#allocation6 + $0x3]  }
  0x51   :  { %s77_s11 = sshll.u32 %s796_s10, 4  ;;  %s911_s13 = sld [smem:[#allocation3 + $0x4]]  ;;  %s78_s11 = int_to_ptr.vmem [resolvable:$true] %s77_s11 }
  0x52   :  { %s452_s14 = scalar_lea.hbm %s68_s9, 16  ;;  %p455_p0 = scmp.lt.u32.totalorder %s68_s9, %s1135_s1 }
  0x53   :  { %p453_p13 = scmp.ne.s32.totalorder %s68_s9, %s452_s14  ;;  %p456_p1 = scmp.lt.u32.totalorder %s862_s12, %s452_s14 }
  0x54   :  { %p458_p3 = scmp.lt.u32.totalorder %s452_s14, %s68_s9 }
  0x55   :  { %p457_p2 = por %p456_p1, %p455_p0 }
  0x57   :  { %p459_p4 = por %p458_p3, %p457_p2 }
  0x59   :  { %p460_p5 = pnand %p459_p4, %p453_p13 }
  0x5b   :  { %463 = shalt.err (!%p460_p5)  }
  0x5c   :  { %s464_s30 = scalar_lea.vmem %s78_s11, 16  ;;  %p469_p7 = scmp.lt.s32.totalorder %s78_s11, %s845_s24 }
  0x5d   :  { %p465_p6 = scmp.ne.s32.totalorder %s78_s11, %s464_s30  ;;  %p470_p8 = scmp.lt.s32.totalorder %s871_s16, %s464_s30 }
  0x5f   :  { %p471_p9 = por %p470_p8, %p469_p7 }
  0x61   :  { %p472_p10 = pnand %p471_p9, %p465_p6 }
  0x63   :  { %475 = shalt.err (!%p472_p10)  }
  0x64   :  { %80 = dma.hbm_to_vmem [thread:$0]  %s68_s9, 16, %s78_s11, [#allocation2] }
  0x65   :  { %s797_s18 = smov [#allocation6 + $0x4]   ;;  %s919_s20 = sld [smem:[#allocation3 + $0x5]] }
  0x66   :  { %s92_s19 = sshll.u32 %s797_s18, 4  ;;  %s798_s21 = smov [#allocation6 + $0x5]   ;;  %s93_s19 = int_to_ptr.vmem [resolvable:$true] %s92_s19 }
  0x67   :  { %s107_s22 = sshll.u32 %s798_s21, 4  ;;  %s921_s23 = sld [smem:[#allocation3 + $0x6]]  ;;  %s924_s22 = int_to_ptr.vmem [resolvable:$true] %s107_s22 }
  0x68   :  { %s327_s25 = sshll.u32 %s911_s13, 4 }
  0x69   :  { %s83_s29 = scalar_lea.hbm %s1135_s1, %s327_s25 }
  0x6a   :  { %s476_s4 = scalar_lea.hbm %s83_s29, 16  ;;  %p479_p13 = scmp.lt.u32.totalorder %s83_s29, %s1135_s1 }
  0x6b   :  { %p477_p12 = scmp.ne.s32.totalorder %s83_s29, %s476_s4  ;;  %p480_p0 = scmp.lt.u32.totalorder %s862_s12, %s476_s4 }
  0x6c   :  { %p482_p2 = scmp.lt.u32.totalorder %s476_s4, %s83_s29 }
  0x6d   :  { %p481_p1 = por %p480_p0, %p479_p13 }
  0x6f   :  { %p483_p3 = por %p482_p2, %p481_p1 }
  0x71   :  { %p484_p4 = pnand %p483_p3, %p477_p12 }
  0x73   :  { %487 = shalt.err (!%p484_p4)  }
  0x74   :  { %s488_s7 = scalar_lea.vmem %s93_s19, 16  ;;  %p493_p6 = scmp.lt.s32.totalorder %s93_s19, %s845_s24 }
  0x75   :  { %p489_p5 = scmp.ne.s32.totalorder %s93_s19, %s488_s7  ;;  %p494_p7 = scmp.lt.s32.totalorder %s871_s16, %s488_s7 }
  0x77   :  { %p495_p8 = por %p494_p7, %p493_p6 }
  0x79   :  { %p496_p9 = pnand %p495_p8, %p489_p5 }
  0x7b   :  { %499 = shalt.err (!%p496_p9)  }
  0x7c   :  { %95 = dma.hbm_to_vmem [thread:$0]  %s83_s29, 16, %s93_s19, [#allocation2] }
  0x7d   :  { %s329_s27 = sshll.u32 %s919_s20, 4  ;;  %s799_s0 = smov [#allocation6 + $0x6]  }
  0x7e   :  { %s122_s8 = sshll.u32 %s799_s0, 4  ;;  %s98_s11 = scalar_lea.hbm %s1135_s1, %s329_s27  ;;  %s939_s8 = int_to_ptr.vmem [resolvable:$true] %s122_s8 }
  0x7f   :  { %s500_s13 = scalar_lea.hbm %s98_s11, 16  ;;  %p503_p12 = scmp.lt.u32.totalorder %s98_s11, %s1135_s1 }
  0x80   :  { %p501_p10 = scmp.ne.s32.totalorder %s98_s11, %s500_s13  ;;  %p504_p13 = scmp.lt.u32.totalorder %s862_s12, %s500_s13 }
  0x81   :  { %p506_p1 = scmp.lt.u32.totalorder %s500_s13, %s98_s11 }
  0x82   :  { %p505_p0 = por %p504_p13, %p503_p12 }
  0x84   :  { %p507_p2 = por %p506_p1, %p505_p0 }
  0x86   :  { %p508_p3 = pnand %p507_p2, %p501_p10 }
  0x88   :  { %511 = shalt.err (!%p508_p3)  }
  0x89   :  { %s512_s17 = scalar_lea.vmem %s924_s22, 16  ;;  %p517_p5 = scmp.lt.s32.totalorder %s924_s22, %s845_s24 }
  0x8a   :  { %p513_p4 = scmp.ne.s32.totalorder %s924_s22, %s512_s17  ;;  %p518_p6 = scmp.lt.s32.totalorder %s871_s16, %s512_s17 }
  0x8c   :  { %p519_p7 = por %p518_p6, %p517_p5 }
  0x8e   :  { %p520_p8 = pnand %p519_p7, %p513_p4 }
  0x90   :  { %523 = shalt.err (!%p520_p8)  }
  0x91   :  { %110 = dma.hbm_to_vmem [thread:$0]  %s98_s11, 16, %s924_s22, [#allocation2] }
  0x92   :  { %s331_s30 = sshll.u32 %s921_s23, 4  ;;  %s952_s18 = sld [smem:[#allocation3 + $0x7]] }
  0x93   :  { %s113_s21 = scalar_lea.hbm %s1135_s1, %s331_s30 }
  0x94   :  { %s524_s25 = scalar_lea.hbm %s113_s21, 16  ;;  %p527_p10 = scmp.lt.u32.totalorder %s113_s21, %s1135_s1 }
  0x95   :  { %p525_p9 = scmp.ne.s32.totalorder %s113_s21, %s524_s25  ;;  %p528_p12 = scmp.lt.u32.totalorder %s862_s12, %s524_s25 }
  0x96   :  { %p530_p0 = scmp.lt.u32.totalorder %s524_s25, %s113_s21 }
  0x97   :  { %p529_p13 = por %p528_p12, %p527_p10 }
  0x99   :  { %p531_p1 = por %p530_p0, %p529_p13 }
  0x9b   :  { %p532_p2 = pnand %p531_p1, %p525_p9 }
  0x9d   :  { %535 = shalt.err (!%p532_p2)  }
  0x9e   :  { %s536_s22 = scalar_lea.vmem %s939_s8, 16  ;;  %p541_p4 = scmp.lt.s32.totalorder %s939_s8, %s845_s24 }
  0x9f   :  { %p537_p3 = scmp.ne.s32.totalorder %s939_s8, %s536_s22  ;;  %p542_p5 = scmp.lt.s32.totalorder %s871_s16, %s536_s22 }
  0xa1   :  { %p543_p6 = por %p542_p5, %p541_p4 }
  0xa3   :  { %p544_p7 = pnand %p543_p6, %p537_p3 }
  0xa5   :  { %547 = shalt.err (!%p544_p7)  }
  0xa6   :  { %125 = dma.hbm_to_vmem [thread:$0]  %s113_s21, 16, %s939_s8, [#allocation2] }
  0xa7   :  { %s800_s23 = smov [#allocation6 + $0x7]   ;;  %s967_s4 = sld [smem:[#allocation3 + $0x8]] }
  0xa8   :  { %s137_s29 = sshll.u32 %s800_s23, 4  ;;  %s801_s5 = smov [#allocation6 + $0x8]   ;;  %s138_s29 = int_to_ptr.vmem [resolvable:$true] %s137_s29 }
  0xa9   :  { %s152_s6 = sshll.u32 %s801_s5, 4  ;;  %s969_s7 = sld [smem:[#allocation3 + $0x9]]  ;;  %s972_s6 = int_to_ptr.vmem [resolvable:$true] %s152_s6 }
  0xaa   :  { %s333_s27 = sshll.u32 %s952_s18, 4 }
  0xab   :  { %s128_s10 = scalar_lea.hbm %s1135_s1, %s333_s27 }
  0xac   :  { %s548_s11 = scalar_lea.hbm %s128_s10, 16  ;;  %p551_p9 = scmp.lt.u32.totalorder %s128_s10, %s1135_s1 }
  0xad   :  { %p549_p8 = scmp.ne.s32.totalorder %s128_s10, %s548_s11  ;;  %p552_p10 = scmp.lt.u32.totalorder %s862_s12, %s548_s11 }
  0xae   :  { %p554_p13 = scmp.lt.u32.totalorder %s548_s11, %s128_s10 }
  0xaf   :  { %p553_p12 = por %p552_p10, %p551_p9 }
  0xb1   :  { %p555_p0 = por %p554_p13, %p553_p12 }
  0xb3   :  { %p556_p1 = pnand %p555_p0, %p549_p8 }
  0xb5   :  { %559 = shalt.err (!%p556_p1)  }
  0xb6   :  { %s560_s14 = scalar_lea.vmem %s138_s29, 16  ;;  %p565_p3 = scmp.lt.s32.totalorder %s138_s29, %s845_s24 }
  0xb7   :  { %p561_p2 = scmp.ne.s32.totalorder %s138_s29, %s560_s14  ;;  %p566_p4 = scmp.lt.s32.totalorder %s871_s16, %s560_s14 }
  0xb9   :  { %p567_p5 = por %p566_p4, %p565_p3 }
  0xbb   :  { %p568_p6 = pnand %p567_p5, %p561_p2 }
  0xbd   :  { %571 = shalt.err (!%p568_p6)  }
  0xbe   :  { %140 = dma.hbm_to_vmem [thread:$0]  %s128_s10, 16, %s138_s29, [#allocation2] }
  0xbf   :  { %s335_s15 = sshll.u32 %s967_s4, 4  ;;  %s802_s17 = smov [#allocation6 + $0x9]  }
  0xc0   :  { %s167_s1 = sshll.u32 %s802_s17, 4  ;;  %s143_s18 = scalar_lea.hbm %s1136_s2, %s335_s15  ;;  %s987_s1 = int_to_ptr.vmem [resolvable:$true] %s167_s1 }
  0xc1   :  { %s572_s19 = scalar_lea.hbm %s143_s18, 16  ;;  %s992_s25 = scalar_lea.hbm %s1136_s2, 1024 }
  0xc2   :  { %p573_p7 = scmp.ne.s32.totalorder %s143_s18, %s572_s19  ;;  %p575_p8 = scmp.lt.u32.totalorder %s143_s18, %s1136_s2 }
  0xc3   :  { %p576_p9 = scmp.lt.u32.totalorder %s992_s25, %s572_s19  ;;  %p578_p12 = scmp.lt.u32.totalorder %s572_s19, %s143_s18 }
  0xc5   :  { %p577_p10 = por %p576_p9, %p575_p8 }
  0xc7   :  { %p579_p13 = por %p578_p12, %p577_p10 }
  0xc9   :  { %p580_p0 = pnand %p579_p13, %p573_p7 }
  0xcb   :  { %583 = shalt.err (!%p580_p0)  }
  0xcc   :  { %s584_s22 = scalar_lea.vmem %s972_s6, 16  ;;  %p589_p2 = scmp.lt.s32.totalorder %s972_s6, %s845_s24 }
  0xcd   :  { %p585_p1 = scmp.ne.s32.totalorder %s972_s6, %s584_s22  ;;  %p590_p3 = scmp.lt.s32.totalorder %s871_s16, %s584_s22 }
  0xcf   :  { %p591_p4 = por %p590_p3, %p589_p2 }
  0xd1   :  { %p592_p5 = pnand %p591_p4, %p585_p1 }
  0xd3   :  { %595 = shalt.err (!%p592_p5)  }
  0xd4   :  { %155 = dma.hbm_to_vmem [thread:$0]  %s143_s18, 16, %s972_s6, [#allocation2] }
  0xd5   :  { %s337_s23 = sshll.u32 %s969_s7, 4  ;;  %s1005_s29 = sld [smem:[#allocation3 + $0xa]] }
  0xd6   :  { %s158_s27 = scalar_lea.hbm %s1136_s2, %s337_s23 }
  0xd7   :  { %s596_s0 = scalar_lea.hbm %s158_s27, 16  ;;  %p599_p7 = scmp.lt.u32.totalorder %s158_s27, %s1136_s2 }
  0xd8   :  { %p597_p6 = scmp.ne.s32.totalorder %s158_s27, %s596_s0  ;;  %p600_p8 = scmp.lt.u32.totalorder %s992_s25, %s596_s0 }
  0xd9   :  { %p602_p10 = scmp.lt.u32.totalorder %s596_s0, %s158_s27 }
  0xda   :  { %p601_p9 = por %p600_p8, %p599_p7 }
  0xdc   :  { %p603_p12 = por %p602_p10, %p601_p9 }
  0xde   :  { %p604_p13 = pnand %p603_p12, %p597_p6 }
  0xe0   :  { %607 = shalt.err (!%p604_p13)  }
  0xe1   :  { %s608_s6 = scalar_lea.vmem %s987_s1, 16  ;;  %p613_p1 = scmp.lt.s32.totalorder %s987_s1, %s845_s24 }
  0xe2   :  { %p609_p0 = scmp.ne.s32.totalorder %s987_s1, %s608_s6  ;;  %p614_p2 = scmp.lt.s32.totalorder %s871_s16, %s608_s6 }
  0xe4   :  { %p615_p3 = por %p614_p2, %p613_p1 }
  0xe6   :  { %p616_p4 = pnand %p615_p3, %p609_p0 }
  0xe8   :  { %619 = shalt.err (!%p616_p4)  }
  0xe9   :  { %170 = dma.hbm_to_vmem [thread:$0]  %s158_s27, 16, %s987_s1, [#allocation2] }
  0xea   :  { %s803_s7 = smov [#allocation6 + $0xa]   ;;  %s1020_s13 = sld [smem:[#allocation3 + $0xb]] }
  0xeb   :  { %s182_s11 = sshll.u32 %s803_s7, 4  ;;  %s804_s8 = smov [#allocation6 + $0xb]   ;;  %s183_s11 = int_to_ptr.vmem [resolvable:$true] %s182_s11 }
  0xec   :  { %s197_s14 = sshll.u32 %s804_s8, 4  ;;  %s1022_s15 = sld [smem:[#allocation3 + $0xc]]  ;;  %s1025_s14 = int_to_ptr.vmem [resolvable:$true] %s197_s14 }
  0xed   :  { %s339_s17 = sshll.u32 %s1005_s29, 4 }
  0xee   :  { %s173_s18 = scalar_lea.hbm %s1136_s2, %s339_s17 }
  0xef   :  { %s620_s19 = scalar_lea.hbm %s173_s18, 16  ;;  %p623_p6 = scmp.lt.u32.totalorder %s173_s18, %s1136_s2 }
  0xf0   :  { %p621_p5 = scmp.ne.s32.totalorder %s173_s18, %s620_s19  ;;  %p624_p7 = scmp.lt.u32.totalorder %s992_s25, %s620_s19 }
  0xf1   :  { %p626_p9 = scmp.lt.u32.totalorder %s620_s19, %s173_s18 }
  0xf2   :  { %p625_p8 = por %p624_p7, %p623_p6 }
  0xf4   :  { %p627_p10 = por %p626_p9, %p625_p8 }
  0xf6   :  { %p628_p12 = pnand %p627_p10, %p621_p5 }
  0xf8   :  { %631 = shalt.err (!%p628_p12)  }
  0xf9   :  { %s632_s21 = scalar_lea.vmem %s183_s11, 16  ;;  %p637_p0 = scmp.lt.s32.totalorder %s183_s11, %s845_s24 }
  0xfa   :  { %p633_p13 = scmp.ne.s32.totalorder %s183_s11, %s632_s21  ;;  %p638_p1 = scmp.lt.s32.totalorder %s871_s16, %s632_s21 }
  0xfc   :  { %p639_p2 = por %p638_p1, %p637_p0 }
  0xfe   :  { %p640_p3 = pnand %p639_p2, %p633_p13 }
 0x100   :  { %643 = shalt.err (!%p640_p3)  }
 0x101   :  { %185 = dma.hbm_to_vmem [thread:$0]  %s173_s18, 16, %s183_s11, [#allocation2] }
 0x102   :  { %s341_s26 = sshll.u32 %s1020_s13, 4  ;;  %s805_s28 = smov [#allocation6 + $0xc]  }
 0x103   :  { %s212_s22 = sshll.u32 %s805_s28, 4  ;;  %s188_s4 = scalar_lea.hbm %s1136_s2, %s341_s26  ;;  %s1040_s22 = int_to_ptr.vmem [resolvable:$true] %s212_s22 }
 0x104   :  { %s644_s5 = scalar_lea.hbm %s188_s4, 16  ;;  %p647_p5 = scmp.lt.u32.totalorder %s188_s4, %s1136_s2 }
 0x105   :  { %p645_p4 = scmp.ne.s32.totalorder %s188_s4, %s644_s5  ;;  %p648_p6 = scmp.lt.u32.totalorder %s992_s25, %s644_s5 }
 0x106   :  { %p650_p8 = scmp.lt.u32.totalorder %s644_s5, %s188_s4 }
 0x107   :  { %p649_p7 = por %p648_p6, %p647_p5 }
 0x109   :  { %p651_p9 = por %p650_p8, %p649_p7 }
 0x10b   :  { %p652_p10 = pnand %p651_p9, %p645_p4 }
 0x10d   :  { %655 = shalt.err (!%p652_p10)  }
 0x10e   :  { %s656_s9 = scalar_lea.vmem %s1025_s14, 16  ;;  %p661_p13 = scmp.lt.s32.totalorder %s1025_s14, %s845_s24 }
 0x10f   :  { %p657_p12 = scmp.ne.s32.totalorder %s1025_s14, %s656_s9  ;;  %p662_p0 = scmp.lt.s32.totalorder %s871_s16, %s656_s9 }
 0x111   :  { %p663_p1 = por %p662_p0, %p661_p13 }
 0x113   :  { %p664_p2 = pnand %p663_p1, %p657_p12 }
 0x115   :  { %667 = shalt.err (!%p664_p2)  }
 0x116   :  { %200 = dma.hbm_to_vmem [thread:$0]  %s188_s4, 16, %s1025_s14, [#allocation2] }
 0x117   :  { %s343_s10 = sshll.u32 %s1022_s15, 4  ;;  %s1053_s6 = sld [smem:[#allocation3 + $0xd]] }
 0x118   :  { %s203_s13 = scalar_lea.hbm %s1136_s2, %s343_s10 }
 0x119   :  { %s668_s8 = scalar_lea.hbm %s203_s13, 16  ;;  %p671_p4 = scmp.lt.u32.totalorder %s203_s13, %s1136_s2 }
 0x11a   :  { %p669_p3 = scmp.ne.s32.totalorder %s203_s13, %s668_s8  ;;  %p672_p5 = scmp.lt.u32.totalorder %s992_s25, %s668_s8 }
 0x11b   :  { %p674_p7 = scmp.lt.u32.totalorder %s668_s8, %s203_s13 }
 0x11c   :  { %p673_p6 = por %p672_p5, %p671_p4 }
 0x11e   :  { %p675_p8 = por %p674_p7, %p673_p6 }
 0x120   :  { %p676_p9 = pnand %p675_p8, %p669_p3 }
 0x122   :  { %679 = shalt.err (!%p676_p9)  }
 0x123   :  { %s680_s14 = scalar_lea.vmem %s1040_s22, 16  ;;  %p685_p12 = scmp.lt.s32.totalorder %s1040_s22, %s845_s24 }
 0x124   :  { %p681_p10 = scmp.ne.s32.totalorder %s1040_s22, %s680_s14  ;;  %p686_p13 = scmp.lt.s32.totalorder %s871_s16, %s680_s14 }
 0x126   :  { %p687_p0 = por %p686_p13, %p685_p12 }
 0x128   :  { %p688_p1 = pnand %p687_p0, %p681_p10 }
 0x12a   :  { %691 = shalt.err (!%p688_p1)  }
 0x12b   :  { %215 = dma.hbm_to_vmem [thread:$0]  %s203_s13, 16, %s1040_s22, [#allocation2] }
 0x12c   :  { %s806_s15 = smov [#allocation6 + $0xd]   ;;  %s1068_s18 = sld [smem:[#allocation3 + $0xe]] }
 0x12d   :  { %s227_s30 = sshll.u32 %s806_s15, 4  ;;  %s807_s19 = smov [#allocation6 + $0xe]   ;;  %s228_s30 = int_to_ptr.vmem [resolvable:$true] %s227_s30 }
 0x12e   :  { %s242_s20 = sshll.u32 %s807_s19, 4  ;;  %s1070_s1 = sld [smem:[#allocation3 + $0xf]]  ;;  %s1073_s20 = int_to_ptr.vmem [resolvable:$true] %s242_s20 }
 0x12f   :  { %s345_s21 = sshll.u32 %s1053_s6, 4 }
 0x130   :  { %s218_s23 = scalar_lea.hbm %s1136_s2, %s345_s21 }
 0x131   :  { %s692_s29 = scalar_lea.hbm %s218_s23, 16  ;;  %p695_p3 = scmp.lt.u32.totalorder %s218_s23, %s1136_s2 }
 0x132   :  { %p693_p2 = scmp.ne.s32.totalorder %s218_s23, %s692_s29  ;;  %p696_p4 = scmp.lt.u32.totalorder %s992_s25, %s692_s29 }
 0x133   :  { %p698_p6 = scmp.lt.u32.totalorder %s692_s29, %s218_s23 }
 0x134   :  { %p697_p5 = por %p696_p4, %p695_p3 }
 0x136   :  { %p699_p7 = por %p698_p6, %p697_p5 }
 0x138   :  { %p700_p8 = pnand %p699_p7, %p693_p2 }
 0x13a   :  { %703 = shalt.err (!%p700_p8)  }
 0x13b   :  { %s704_s5 = scalar_lea.vmem %s228_s30, 16  ;;  %p709_p10 = scmp.lt.s32.totalorder %s228_s30, %s845_s24 }
 0x13c   :  { %p705_p9 = scmp.ne.s32.totalorder %s228_s30, %s704_s5  ;;  %p710_p12 = scmp.lt.s32.totalorder %s871_s16, %s704_s5 }
 0x13e   :  { %p711_p13 = por %p710_p12, %p709_p10 }
 0x140   :  { %p712_p0 = pnand %p711_p13, %p705_p9 }
 0x142   :  { %715 = shalt.err (!%p712_p0)  }
 0x143   :  { %230 = dma.hbm_to_vmem [thread:$0]  %s218_s23, 16, %s228_s30, [#allocation2] }
 0x144   :  { %s347_s27 = sshll.u32 %s1068_s18, 4  ;;  %s808_s0 = smov [#allocation6 + $0xf]  }
 0x145   :  { %s257_s9 = sshll.u32 %s808_s0, 4  ;;  %s233_s7 = scalar_lea.hbm %s1136_s2, %s347_s27  ;;  %s1088_s9 = int_to_ptr.vmem [resolvable:$true] %s257_s9 }
 0x146   :  { %s716_s11 = scalar_lea.hbm %s233_s7, 16  ;;  %p719_p2 = scmp.lt.u32.totalorder %s233_s7, %s1136_s2 }
 0x147   :  { %p717_p1 = scmp.ne.s32.totalorder %s233_s7, %s716_s11  ;;  %p720_p3 = scmp.lt.u32.totalorder %s992_s25, %s716_s11 }
 0x148   :  { %p722_p5 = scmp.lt.u32.totalorder %s716_s11, %s233_s7 }
 0x149   :  { %p721_p4 = por %p720_p3, %p719_p2 }
 0x14b   :  { %p723_p6 = por %p722_p5, %p721_p4 }
 0x14d   :  { %p724_p7 = pnand %p723_p6, %p717_p1 }
 0x14f   :  { %727 = shalt.err (!%p724_p7)  }
 0x150   :  { %s728_s17 = scalar_lea.vmem %s1073_s20, 16  ;;  %p733_p9 = scmp.lt.s32.totalorder %s1073_s20, %s845_s24 }
 0x151   :  { %p729_p8 = scmp.ne.s32.totalorder %s1073_s20, %s728_s17  ;;  %p734_p10 = scmp.lt.s32.totalorder %s871_s16, %s728_s17 }
 0x153   :  { %p735_p12 = por %p734_p10, %p733_p9 }
 0x155   :  { %p736_p13 = pnand %p735_p12, %p729_p8 }
 0x157   :  { %739 = shalt.err (!%p736_p13)  }
 0x158   :  { %245 = dma.hbm_to_vmem [thread:$0]  %s233_s7, 16, %s1073_s20, [#allocation2] }
 0x159   :  { %s349_s12 = sshll.u32 %s1070_s1, 4 }
 0x15a   :  { %s248_s30 = scalar_lea.hbm %s1136_s2, %s349_s12 }
 0x15b   :  { %s740_s18 = scalar_lea.hbm %s248_s30, 16  ;;  %p743_p1 = scmp.lt.u32.totalorder %s248_s30, %s1136_s2 }
 0x15c   :  { %p741_p0 = scmp.ne.s32.totalorder %s248_s30, %s740_s18  ;;  %p744_p2 = scmp.lt.u32.totalorder %s992_s25, %s740_s18 }
 0x15d   :  { %p746_p4 = scmp.lt.u32.totalorder %s740_s18, %s248_s30 }
 0x15e   :  { %p745_p3 = por %p744_p2, %p743_p1 }
 0x160   :  { %p747_p5 = por %p746_p4, %p745_p3 }
 0x162   :  { %p748_p6 = pnand %p747_p5, %p741_p0 }
 0x164   :  { %751 = shalt.err (!%p748_p6)  }
 0x165   :  { %s752_s20 = scalar_lea.vmem %s1088_s9, 16  ;;  %p757_p8 = scmp.lt.s32.totalorder %s1088_s9, %s845_s24 }
 0x166   :  { %p753_p7 = scmp.ne.s32.totalorder %s1088_s9, %s752_s20  ;;  %p758_p9 = scmp.lt.s32.totalorder %s871_s16, %s752_s20 }
 0x168   :  { %p759_p10 = por %p758_p9, %p757_p8 }
 0x16a   :  { %p760_p12 = pnand %p759_p10, %p753_p7 }
 0x16c   :  { %763 = shalt.err (!%p760_p12)  }
 0x16d   :  { %260 = dma.hbm_to_vmem [thread:$0]  %s248_s30, 16, %s1088_s9, [#allocation2] }
 0x16e   :  { %788 = dma.done.wait [#allocation2], 256 }
 0x16f   :  { %789 = vsyncadd [#allocation2], 4294967040  ;;  %p765_p13 = scmp.ne.s32.totalorder %s845_s24, %s871_s16  ;;  %p770_p0 = scmp.lt.s32.totalorder %s871_s16, %s871_s16 }
 0x171   :  { %p771_p1 = por %p770_p0, %p397_p11 }
 0x173   :  { %p772_p2 = pnand %p771_p1, %p765_p13 }
 0x175   :  { %775 = shalt.err (!%p772_p2)
}
 0x176   :  { %s776_s1 = scalar_lea.hbm %s1137_s3, 256 }
 0x177   :  { %p777_p3 = scmp.ne.s32.totalorder %s1137_s3, %s776_s1  ;;  %p780_p4 = scmp.lt.u32.totalorder %s776_s1, %s1137_s3 }
 0x179   :  { %p782_p5 = pnand %p780_p4, %p777_p3 }
 0x17b   :  { %785 = shalt.err (!%p782_p5)
}
 0x17c   :  { %s809_s4 = smov 128   ;;  %s810_s16 = smov 8  }
 0x17d   :  { %275 = dma.vmem_to_hbm [thread:$0]  %s845_s24, 256, %s1137_s3, [#allocation4], %s809_s4, %s809_s4, %s810_s16  }
 0x17e   :  { %790 = dma.done.wait [#allocation4], 256  }
 0x17f   :  { %791 = vsyncadd [#allocation4], 4294967040 }
 0x180   :  { %279 = vsyncpa [#allocation4], 1 }
 0x181   :  { %280 = vsyncpa [#allocation5], 1 }
 0x182   :  { %281 = vsyncmov [#allocation2] }
 0x185   :  { %s282_s27 = vpop.sfrf %281 }
 0x186   :  { %p350_p11 = scmp.ne.s32.totalorder %s282_s27, 0 }
 0x188   :  { %286 = shalt.err (%p350_p11)  }

</bundles_post_ra>
